<compile_context>
chip_gen: v7x
topology: tpu7x:2x2x1
jax: 0.10.0
libtpu: 0.0.40
codegen_flags: <defaults>
</compile_context>

<pallas_src>
import itertools
import numpy as np
import jax
import jax.numpy as jnp
from jax.experimental import pallas as pl
from jax.experimental.pallas import tpu as pltpu

COST_CLASS = 1.0
COST_BBOX = 1.0
COST_GIOU = 1.0

_EPS = 1e-20


def _round_up(x, m):
    return ((x + m - 1) // m) * m


def _cost_kernel(logits_ref, onehot_t_ref, pred_ref, tgt_ref, cost_ref):
    # ---- classification cost: -(exp(x - m) @ onehot^T) * rcp(sum)  (deferred normalization) ----
    logits = logits_ref[...].astype(jnp.float32)               # [TQ, C_pad] (bf16 in HBM)
    m = jnp.max(logits, axis=-1, keepdims=True)
    e = jnp.exp(logits - m)                                     # [TQ, C_pad]
    neg_inv_sum = -pl.reciprocal(jnp.sum(e, axis=-1, keepdims=True), approx=True)   # [TQ, 1]
    eo = jnp.dot(e.astype(jnp.bfloat16), onehot_t_ref[...],
                 preferred_element_type=jnp.float32)            # [TQ, T_pad] (MXU)
    cost_class = eo * neg_inv_sum                               # == -softmax(x) @ onehot^T

    # ---- derive xyxy / areas on narrow columns (O(TQ) + O(T) work, done pre-broadcast) ----
    pb = pred_ref[...]                                          # [TQ, 4]  cxcywh
    ocx, ocy, ow, oh = pb[:, 0:1], pb[:, 1:2], pb[:, 2:3], pb[:, 3:4]
    ox0, oy0 = ocx - 0.5 * ow, ocy - 0.5 * oh
    ox1, oy1 = ocx + 0.5 * ow, ocy + 0.5 * oh
    oarea = ow * oh                                             # [TQ, 1]

    tb = tgt_ref[...]                                           # [4, T_pad]  cxcywh
    tcx, tcy, tw, th = tb[0:1, :], tb[1:2, :], tb[2:3, :], tb[3:4, :]
    tx0, ty0 = tcx - 0.5 * tw, tcy - 0.5 * th
    tx1, ty1 = tcx + 0.5 * tw, tcy + 0.5 * th
    tarea = tw * th                                             # [1, T_pad]

    # ---- bbox L1 (cdist p=1) cost ----
    cost_bbox = (jnp.abs(ocx - tcx) + jnp.abs(ocy - tcy)
                 + jnp.abs(ow - tw) + jnp.abs(oh - th))         # [TQ, T_pad]

    # hoist lane-broadcasts of pred xyxy (each reused by intersection AND enclosing-box terms)
    shape = cost_ref.shape
    bx0 = jnp.broadcast_to(ox0, shape)
    by0 = jnp.broadcast_to(oy0, shape)
    bx1 = jnp.broadcast_to(ox1, shape)
    by1 = jnp.broadcast_to(oy1, shape)

    # ---- IoU / GIoU ----
    iw = jnp.maximum(jnp.minimum(bx1, tx1) - jnp.maximum(bx0, tx0), 0.0)
    ih = jnp.maximum(jnp.minimum(by1, ty1) - jnp.maximum(by0, ty0), 0.0)
    inter = iw * ih
    union = oarea + tarea - inter
    iou = inter * pl.reciprocal(union + _EPS, approx=True)

    # enclosing box: no clamp needed — valid boxes (w,h >= 0) guarantee nonneg extents.
    ew = jnp.maximum(bx1, tx1) - jnp.minimum(bx0, tx0)
    eh = jnp.maximum(by1, ty1) - jnp.minimum(by0, ty0)
    earea = ew * eh
    giou = iou - (earea - union) * pl.reciprocal(earea + _EPS, approx=True)

    cost_ref[...] = (COST_BBOX * cost_bbox
                     + COST_CLASS * cost_class
                     - COST_GIOU * giou)


def cost_matrix_pallas(pred_logits, pred_boxes, labels_list, boxes_list, tile_q=1024):
    """Per-image cost matrices. Returns [bs, NQ_pad, T_pad]; slice [b, :nq, :sizes[b]]."""
    bs, nq, num_classes = pred_logits.shape
    sizes = [int(b.shape[0]) for b in boxes_list]
    T_max = max(max(sizes), 1)

    # ---- lane-aligned padded extents ----
    C_pad = _round_up(max(num_classes, 128), 128)
    T_pad = _round_up(max(T_max, 128), 128)

    TILE_Q = min(int(tile_q), _round_up(nq, 8))
    # v7x has 2 TensorCores: make sure the ("parallel","parallel") grid has >= 2 steps when possible.
    if bs * ((nq + TILE_Q - 1) // TILE_Q) < 2 and nq >= 16:
        TILE_Q = _round_up((nq + 1) // 2, 8)

    # Re-derive the VMEM budget (double-buffered blocks); v7x has only 64 MiB physical VMEM.
    def _block_bytes(tq):
        return 2 * (tq * C_pad * 2        # logits bf16
                    + C_pad * T_pad * 2   # onehot bf16 (resident)
                    + tq * 4 * 4          # pred boxes f32
                    + 4 * T_pad * 4       # target boxes f32 (resident)
                    + tq * T_pad * 4)     # cost output f32

    while _block_bytes(TILE_Q) > (48 << 20) and TILE_Q > 8:
        TILE_Q = max(8, _round_up(TILE_Q // 2, 8))
    NQ_pad = _round_up(nq, TILE_Q)
    vmem_limit = int(min(max(_block_bytes(TILE_Q) + (4 << 20), 32 << 20), 60 << 20))

    # ---- wrapper-side padding: one jnp.pad per array, in the dtype fed to the kernel ----
    # logits: bf16, pad classes / extra query rows with a large negative (softmax unaffected, no NaN)
    logits = jnp.pad(pred_logits.astype(jnp.bfloat16),
                     ((0, 0), (0, NQ_pad - nq), (0, C_pad - num_classes)),
                     constant_values=-1e9)                                 # [bs, NQ_pad, C_pad]

    # pred boxes: f32 cxcywh, pad extra query rows with a valid dummy box (cx=cy=w=h=0.5)
    pred_b = jnp.pad(pred_boxes.astype(jnp.float32),
                     ((0, 0), (0, NQ_pad - nq), (0, 0)),
                     constant_values=0.5)                                  # [bs, NQ_pad, 4]

    # per-image target slabs: one-hot^T (bf16, exact) and cxcywh^T (f32), padded to T_pad columns
    onehots, tgts = [], []
    for labels, boxes, sz in zip(labels_list, boxes_list, sizes):
        oh = jax.nn.one_hot(labels, C_pad, dtype=jnp.bfloat16).T           # [C_pad, sz]
        onehots.append(jnp.pad(oh, ((0, 0), (0, T_pad - sz))))             # zero cols -> cost 0
        tb = boxes.astype(jnp.float32).T                                    # [4, sz]
        tgts.append(jnp.pad(tb, ((0, 0), (0, T_pad - sz)), constant_values=0.5))  # valid dummies
    onehot_t = jnp.stack(onehots)                                           # [bs, C_pad, T_pad]
    tgt_slab = jnp.stack(tgts)                                              # [bs, 4, T_pad]

    grid = (bs, NQ_pad // TILE_Q)
    cost = pl.pallas_call(
        _cost_kernel,
        out_shape=jax.ShapeDtypeStruct((bs, NQ_pad, T_pad), jnp.float32),
        grid=grid,
        in_specs=[
            pl.BlockSpec((None, TILE_Q, C_pad), lambda b, q: (b, q, 0)),   # logits (tiled over Q)
            pl.BlockSpec((None, C_pad, T_pad), lambda b, q: (b, 0, 0)),    # one-hot (per-batch resident)
            pl.BlockSpec((None, TILE_Q, 4), lambda b, q: (b, q, 0)),       # pred boxes (tiled over Q)
            pl.BlockSpec((None, 4, T_pad), lambda b, q: (b, 0, 0)),        # target boxes (per-batch resident)
        ],
        out_specs=pl.BlockSpec((None, TILE_Q, T_pad), lambda b, q: (b, q, 0)),
        compiler_params=pltpu.CompilerParams(
            dimension_semantics=("parallel", "parallel"),
            vmem_limit_bytes=vmem_limit),
    )(logits, onehot_t, pred_b, tgt_slab)
    return cost


def _lsa_bruteforce(cost):
    """Exact linear sum assignment for a small rectangular cost matrix [nq, nt], nq >= nt."""
    # TODO(synk): scipy.optimize.linear_sum_assignment (Hungarian) is inherently sequential;
    # done on host instead of in Pallas. Factorial cost: only viable for tiny num_queries.
    nq, nt = cost.shape
    best_s, best_perm = None, None
    for perm in itertools.permutations(range(nq), nt):
        s = sum(cost[perm[j], j] for j in range(nt))
        if best_s is None or s < best_s:
            best_s, best_perm = s, perm
    rows = np.asarray(best_perm, dtype=np.int64)
    cols = np.arange(nt, dtype=np.int64)
    order = np.argsort(rows)
    return rows[order], cols[order]


def hungarian_matcher(outputs, targets):
    labels_list = [t["labels"] for t in targets]
    boxes_list = [t["boxes"] for t in targets]
    bs, nq = outputs["pred_logits"].shape[:2]
    sizes = [int(b.shape[0]) for b in boxes_list]

    C = cost_matrix_pallas(outputs["pred_logits"], outputs["pred_boxes"],
                           labels_list, boxes_list)
    C = np.asarray(jax.block_until_ready(C))

    indices, blocks = [], []
    for b, sz in enumerate(sizes):
        sub = C[b, :nq, :sz]
        blocks.append(sub)
        indices.append(_lsa_bruteforce(sub))
    return indices, blocks


def _reference_cost(outputs, targets):
    """Pure-JAX f32 reference for the full concatenated cost matrix (verification only)."""
    bs, nq, nc = outputs["pred_logits"].shape
    out_prob = jax.nn.softmax(outputs["pred_logits"].reshape(-1, nc), axis=-1)
    out_bbox = outputs["pred_boxes"].reshape(-1, 4)
    tgt_ids = jnp.concatenate([t["labels"] for t in targets])
    tgt_bbox = jnp.concatenate([t["boxes"] for t in targets])

    cost_class = -out_prob[:, tgt_ids]
    cost_bbox = jnp.sum(jnp.abs(out_bbox[:, None, :] - tgt_bbox[None, :, :]), axis=-1)

    def to_xyxy(b):
        cx, cy, w, h = b[..., 0], b[..., 1], b[..., 2], b[..., 3]
        return jnp.stack([cx - 0.5 * w, cy - 0.5 * h, cx + 0.5 * w, cy + 0.5 * h], -1)

    b1, b2 = to_xyxy(out_bbox), to_xyxy(tgt_bbox)
    a1 = (b1[:, 2] - b1[:, 0]) * (b1[:, 3] - b1[:, 1])
    a2 = (b2[:, 2] - b2[:, 0]) * (b2[:, 3] - b2[:, 1])
    lt = jnp.maximum(b1[:, None, :2], b2[None, :, :2])
    rb = jnp.minimum(b1[:, None, 2:], b2[None, :, 2:])
    wh = jnp.clip(rb - lt, 0.0)
    inter = wh[..., 0] * wh[..., 1]
    union = a1[:, None] + a2[None, :] - inter
    iou = inter / union
    elt = jnp.minimum(b1[:, None, :2], b2[None, :, :2])
    erb = jnp.maximum(b1[:, None, 2:], b2[None, :, 2:])
    ewh = jnp.clip(erb - elt, 0.0)
    earea = ewh[..., 0] * ewh[..., 1]
    giou = iou - (earea - union) / earea
    C = COST_BBOX * cost_bbox + COST_CLASS * cost_class + COST_GIOU * (-giou)
    return C.reshape(bs, nq, -1)


if __name__ == "__main__":
    key = jax.random.PRNGKey(0)
    bs, num_queries, num_classes = 2, 8, 16
    tgt_sizes = [3, 5]

    k1, k2, k3, k4 = jax.random.split(key, 4)
    pred_logits = jax.random.normal(k1, (bs, num_queries, num_classes), jnp.float32)

    # predicted boxes in cxcywh with positive w/h (as DETR's sigmoid outputs would give)
    cxy = jax.random.uniform(k2, (bs, num_queries, 2), jnp.float32, 0.25, 0.75)
    wh = jax.random.uniform(k3, (bs, num_queries, 2), jnp.float32, 0.10, 0.30)
    pred_boxes = jnp.concatenate([cxy, wh], axis=-1)

    targets = []
    tkeys = jax.random.split(k4, len(tgt_sizes) * 3)
    for i, sz in enumerate(tgt_sizes):
        kl, kc, kw = tkeys[3 * i], tkeys[3 * i + 1], tkeys[3 * i + 2]
        labels = jax.random.randint(kl, (sz,), 0, num_classes, jnp.int32)
        tcxy = jax.random.uniform(kc, (sz, 2), jnp.float32, 0.25, 0.75)
        twh = jax.random.uniform(kw, (sz, 2), jnp.float32, 0.10, 0.30)
        targets.append({"labels": labels, "boxes": jnp.concatenate([tcxy, twh], -1)})

    outputs = {"pred_logits": pred_logits, "pred_boxes": pred_boxes}

    indices, cost_blocks = hungarian_matcher(outputs, targets)

    # verify the Pallas per-image cost blocks against a pure-JAX f32 reference (same block-diagonal
    # slices the PyTorch module consumes). Tolerance is loosened vs 1e-5: bf16 logits + bf16 MXU
    # matmul and approximate EUP reciprocals give ~1e-3 errors, irrelevant for argmin matching.
    C_ref = np.asarray(jax.block_until_ready(_reference_cost(outputs, targets)))
    col = 0
    for b, sz in enumerate(tgt_sizes):
        sub_ref = C_ref[b, :, col:col + sz]
        if not np.allclose(cost_blocks[b], sub_ref, rtol=2e-2, atol=2e-2):
            raise AssertionError("Pallas cost matrix mismatch vs reference (batch %d)" % b)
        col += sz

    # sanity: assignment sizes match min(num_queries, num_targets)
    for (ri, ci), sz in zip(indices, tgt_sizes):
        assert len(ri) == len(ci) == min(num_queries, sz)
        assert ri.dtype == np.int64 and ci.dtype == np.int64

    print("KERNEL_OK")
</pallas_src>

<mosaic_0001>
module attributes {stable_mosaic.version = 11 : i64} {
  func.func @_cost_kernel(%arg0: i32, %arg1: i32, %arg2: memref<1x8x128xbf16, #tpu.memory_space<vmem>>, %arg3: memref<1x128x128xbf16, #tpu.memory_space<vmem>>, %arg4: memref<1x8x4xf32, #tpu.memory_space<vmem>>, %arg5: memref<1x4x128xf32, #tpu.memory_space<vmem>>, %arg6: memref<1x8x128xf32, #tpu.memory_space<vmem>>) attributes {dimension_semantics = [#tpu.dimension_semantics<parallel>, #tpu.dimension_semantics<parallel>], iteration_bounds = array<i64: 2, 1>, scalar_prefetch = 0 : i64, scratch_operands = 0 : i64, tpu.core_type = #tpu.core_type<tc>, window_params = [{transform_indices = @transform_0, window_bounds = array<i64: 1, 8, 128>}, {transform_indices = @transform_1, window_bounds = array<i64: 1, 128, 128>}, {transform_indices = @transform_2, window_bounds = array<i64: 1, 8, 4>}, {transform_indices = @transform_3, window_bounds = array<i64: 1, 4, 128>}, {transform_indices = @transform_4, window_bounds = array<i64: 1, 8, 128>}]} {
    %c0 = arith.constant 0 : index
    %c0_0 = arith.constant 0 : index
    %c0_1 = arith.constant 0 : index
    %0 = vector.load %arg2[%c0, %c0_0, %c0_1] : memref<1x8x128xbf16, #tpu.memory_space<vmem>>, vector<1x8x128xbf16>
    %1 = vector.shape_cast %0 : vector<1x8x128xbf16> to vector<8x128xbf16>
    %2 = arith.extf %1 : vector<8x128xbf16> to vector<8x128xf32>
    %cst = arith.constant dense<0xFF800000> : vector<8xf32>
    %3 = vector.multi_reduction <maximumf>, %2, %cst [1] : vector<8x128xf32> to vector<8xf32>
    %4 = vector.shape_cast %3 : vector<8xf32> to vector<8x1xf32>
    %5 = vector.broadcast %4 : vector<8x1xf32> to vector<8x128xf32>
    %6 = arith.subf %2, %5 : vector<8x128xf32>
    %7 = math.exp %6 : vector<8x128xf32>
    %cst_2 = arith.constant dense<0.000000e+00> : vector<8xf32>
    %8 = vector.multi_reduction <add>, %7, %cst_2 [1] : vector<8x128xf32> to vector<8xf32>
    %9 = vector.shape_cast %8 : vector<8xf32> to vector<8x1xf32>
    %10 = tpu.reciprocal %9 {approx = true} : vector<8x1xf32> -> vector<8x1xf32>
    %cst_3 = arith.constant 0.000000e+00 : f32
    %11 = vector.broadcast %cst_3 : f32 to vector<8x1xf32>
    %12 = arith.subf %11, %10 : vector<8x1xf32>
    %13 = arith.truncf %7 : vector<8x128xf32> to vector<8x128xbf16>
    %c0_4 = arith.constant 0 : index
    %c0_5 = arith.constant 0 : index
    %c0_6 = arith.constant 0 : index
    %14 = vector.load %arg3[%c0_4, %c0_5, %c0_6] : memref<1x128x128xbf16, #tpu.memory_space<vmem>>, vector<1x128x128xbf16>
    %15 = vector.shape_cast %14 : vector<1x128x128xbf16> to vector<128x128xbf16>
    %cst_7 = arith.constant dense<0.000000e+00> : vector<8x128xf32>
    %16 = tpu.matmul %13, %15, %cst_7 {dimension_numbers = #tpu.dot_dimension_numbers<[1], [0], [0], [1], [0, 0, 1, 1], [], []>} : vector<8x128xbf16>, vector<128x128xbf16>, vector<8x128xf32> -> vector<8x128xf32>
    %17 = vector.broadcast %12 : vector<8x1xf32> to vector<8x128xf32>
    %18 = arith.mulf %16, %17 : vector<8x128xf32>
    %c0_8 = arith.constant 0 : index
    %c0_9 = arith.constant 0 : index
    %c0_10 = arith.constant 0 : index
    %19 = vector.load %arg4[%c0_8, %c0_9, %c0_10] : memref<1x8x4xf32, #tpu.memory_space<vmem>>, vector<1x8x4xf32>
    %20 = vector.shape_cast %19 : vector<1x8x4xf32> to vector<8x4xf32>
    %21 = vector.extract_strided_slice %20 {offsets = [0, 0], sizes = [8, 1], strides = [1, 1]} : vector<8x4xf32> to vector<8x1xf32>
    %22 = vector.extract_strided_slice %20 {offsets = [0, 1], sizes = [8, 1], strides = [1, 1]} : vector<8x4xf32> to vector<8x1xf32>
    %23 = vector.extract_strided_slice %20 {offsets = [0, 2], sizes = [8, 1], strides = [1, 1]} : vector<8x4xf32> to vector<8x1xf32>
    %24 = vector.extract_strided_slice %20 {offsets = [0, 3], sizes = [8, 1], strides = [1, 1]} : vector<8x4xf32> to vector<8x1xf32>
    %cst_11 = arith.constant 5.000000e-01 : f32
    %25 = vector.broadcast %cst_11 : f32 to vector<8x1xf32>
    %26 = arith.mulf %25, %23 : vector<8x1xf32>
    %27 = arith.subf %21, %26 : vector<8x1xf32>
    %cst_12 = arith.constant 5.000000e-01 : f32
    %28 = vector.broadcast %cst_12 : f32 to vector<8x1xf32>
    %29 = arith.mulf %28, %24 : vector<8x1xf32>
    %30 = arith.subf %22, %29 : vector<8x1xf32>
    %cst_13 = arith.constant 5.000000e-01 : f32
    %31 = vector.broadcast %cst_13 : f32 to vector<8x1xf32>
    %32 = arith.mulf %31, %23 : vector<8x1xf32>
    %33 = arith.addf %21, %32 : vector<8x1xf32>
    %cst_14 = arith.constant 5.000000e-01 : f32
    %34 = vector.broadcast %cst_14 : f32 to vector<8x1xf32>
    %35 = arith.mulf %34, %24 : vector<8x1xf32>
    %36 = arith.addf %22, %35 : vector<8x1xf32>
    %37 = arith.mulf %23, %24 : vector<8x1xf32>
    %c0_15 = arith.constant 0 : index
    %c0_16 = arith.constant 0 : index
    %c0_17 = arith.constant 0 : index
    %38 = vector.load %arg5[%c0_15, %c0_16, %c0_17] : memref<1x4x128xf32, #tpu.memory_space<vmem>>, vector<1x4x128xf32>
    %39 = vector.shape_cast %38 : vector<1x4x128xf32> to vector<4x128xf32>
    %40 = vector.extract_strided_slice %39 {offsets = [0, 0], sizes = [1, 128], strides = [1, 1]} : vector<4x128xf32> to vector<1x128xf32>
    %41 = vector.extract_strided_slice %39 {offsets = [1, 0], sizes = [1, 128], strides = [1, 1]} : vector<4x128xf32> to vector<1x128xf32>
    %42 = vector.extract_strided_slice %39 {offsets = [2, 0], sizes = [1, 128], strides = [1, 1]} : vector<4x128xf32> to vector<1x128xf32>
    %43 = vector.extract_strided_slice %39 {offsets = [3, 0], sizes = [1, 128], strides = [1, 1]} : vector<4x128xf32> to vector<1x128xf32>
    %cst_18 = arith.constant 5.000000e-01 : f32
    %44 = vector.broadcast %cst_18 : f32 to vector<1x128xf32>
    %45 = arith.mulf %44, %42 : vector<1x128xf32>
    %46 = arith.subf %40, %45 : vector<1x128xf32>
    %cst_19 = arith.constant 5.000000e-01 : f32
    %47 = vector.broadcast %cst_19 : f32 to vector<1x128xf32>
    %48 = arith.mulf %47, %43 : vector<1x128xf32>
    %49 = arith.subf %41, %48 : vector<1x128xf32>
    %cst_20 = arith.constant 5.000000e-01 : f32
    %50 = vector.broadcast %cst_20 : f32 to vector<1x128xf32>
    %51 = arith.mulf %50, %42 : vector<1x128xf32>
    %52 = arith.addf %40, %51 : vector<1x128xf32>
    %cst_21 = arith.constant 5.000000e-01 : f32
    %53 = vector.broadcast %cst_21 : f32 to vector<1x128xf32>
    %54 = arith.mulf %53, %43 : vector<1x128xf32>
    %55 = arith.addf %41, %54 : vector<1x128xf32>
    %56 = arith.mulf %42, %43 : vector<1x128xf32>
    %57 = vector.broadcast %21 : vector<8x1xf32> to vector<8x128xf32>
    %58 = vector.broadcast %40 : vector<1x128xf32> to vector<8x128xf32>
    %59 = arith.subf %57, %58 : vector<8x128xf32>
    %60 = math.absf %59 : vector<8x128xf32>
    %61 = vector.broadcast %22 : vector<8x1xf32> to vector<8x128xf32>
    %62 = vector.broadcast %41 : vector<1x128xf32> to vector<8x128xf32>
    %63 = arith.subf %61, %62 : vector<8x128xf32>
    %64 = math.absf %63 : vector<8x128xf32>
    %65 = arith.addf %60, %64 : vector<8x128xf32>
    %66 = vector.broadcast %23 : vector<8x1xf32> to vector<8x128xf32>
    %67 = vector.broadcast %42 : vector<1x128xf32> to vector<8x128xf32>
    %68 = arith.subf %66, %67 : vector<8x128xf32>
    %69 = math.absf %68 : vector<8x128xf32>
    %70 = arith.addf %65, %69 : vector<8x128xf32>
    %71 = vector.broadcast %24 : vector<8x1xf32> to vector<8x128xf32>
    %72 = vector.broadcast %43 : vector<1x128xf32> to vector<8x128xf32>
    %73 = arith.subf %71, %72 : vector<8x128xf32>
    %74 = math.absf %73 : vector<8x128xf32>
    %75 = arith.addf %70, %74 : vector<8x128xf32>
    %76 = vector.shape_cast %27 : vector<8x1xf32> to vector<8x1xf32>
    %77 = vector.broadcast %76 : vector<8x1xf32> to vector<8x128xf32>
    %78 = vector.shape_cast %30 : vector<8x1xf32> to vector<8x1xf32>
    %79 = vector.broadcast %78 : vector<8x1xf32> to vector<8x128xf32>
    %80 = vector.shape_cast %33 : vector<8x1xf32> to vector<8x1xf32>
    %81 = vector.broadcast %80 : vector<8x1xf32> to vector<8x128xf32>
    %82 = vector.shape_cast %36 : vector<8x1xf32> to vector<8x1xf32>
    %83 = vector.broadcast %82 : vector<8x1xf32> to vector<8x128xf32>
    %84 = vector.broadcast %52 : vector<1x128xf32> to vector<8x128xf32>
    %85 = arith.minimumf %81, %84 : vector<8x128xf32>
    %86 = vector.broadcast %46 : vector<1x128xf32> to vector<8x128xf32>
    %87 = arith.maximumf %77, %86 : vector<8x128xf32>
    %88 = arith.subf %85, %87 : vector<8x128xf32>
    %cst_22 = arith.constant 0.000000e+00 : f32
    %89 = vector.broadcast %cst_22 : f32 to vector<8x128xf32>
    %90 = arith.maximumf %88, %89 : vector<8x128xf32>
    %91 = vector.broadcast %55 : vector<1x128xf32> to vector<8x128xf32>
    %92 = arith.minimumf %83, %91 : vector<8x128xf32>
    %93 = vector.broadcast %49 : vector<1x128xf32> to vector<8x128xf32>
    %94 = arith.maximumf %79, %93 : vector<8x128xf32>
    %95 = arith.subf %92, %94 : vector<8x128xf32>
    %cst_23 = arith.constant 0.000000e+00 : f32
    %96 = vector.broadcast %cst_23 : f32 to vector<8x128xf32>
    %97 = arith.maximumf %95, %96 : vector<8x128xf32>
    %98 = arith.mulf %90, %97 : vector<8x128xf32>
    %99 = vector.broadcast %37 : vector<8x1xf32> to vector<8x128xf32>
    %100 = vector.broadcast %56 : vector<1x128xf32> to vector<8x128xf32>
    %101 = arith.addf %99, %100 : vector<8x128xf32>
    %102 = arith.subf %101, %98 : vector<8x128xf32>
    %cst_24 = arith.constant 9.99999968E-21 : f32
    %103 = vector.broadcast %cst_24 : f32 to vector<8x128xf32>
    %104 = arith.addf %102, %103 : vector<8x128xf32>
    %105 = tpu.reciprocal %104 {approx = true} : vector<8x128xf32> -> vector<8x128xf32>
    %106 = arith.mulf %98, %105 : vector<8x128xf32>
    %107 = vector.broadcast %52 : vector<1x128xf32> to vector<8x128xf32>
    %108 = arith.maximumf %81, %107 : vector<8x128xf32>
    %109 = vector.broadcast %46 : vector<1x128xf32> to vector<8x128xf32>
    %110 = arith.minimumf %77, %109 : vector<8x128xf32>
    %111 = arith.subf %108, %110 : vector<8x128xf32>
    %112 = vector.broadcast %55 : vector<1x128xf32> to vector<8x128xf32>
    %113 = arith.maximumf %83, %112 : vector<8x128xf32>
    %114 = vector.broadcast %49 : vector<1x128xf32> to vector<8x128xf32>
    %115 = arith.minimumf %79, %114 : vector<8x128xf32>
    %116 = arith.subf %113, %115 : vector<8x128xf32>
    %117 = arith.mulf %111, %116 : vector<8x128xf32>
    %118 = arith.subf %117, %102 : vector<8x128xf32>
    %cst_25 = arith.constant 9.99999968E-21 : f32
    %119 = vector.broadcast %cst_25 : f32 to vector<8x128xf32>
    %120 = arith.addf %117, %119 : vector<8x128xf32>
    %121 = tpu.reciprocal %120 {approx = true} : vector<8x128xf32> -> vector<8x128xf32>
    %122 = arith.mulf %118, %121 : vector<8x128xf32>
    %123 = arith.subf %106, %122 : vector<8x128xf32>
    %cst_26 = arith.constant 1.000000e+00 : f32
    %124 = vector.broadcast %cst_26 : f32 to vector<8x128xf32>
    %125 = arith.mulf %124, %75 : vector<8x128xf32>
    %cst_27 = arith.constant 1.000000e+00 : f32
    %126 = vector.broadcast %cst_27 : f32 to vector<8x128xf32>
    %127 = arith.mulf %126, %18 : vector<8x128xf32>
    %128 = arith.addf %125, %127 : vector<8x128xf32>
    %cst_28 = arith.constant 1.000000e+00 : f32
    %129 = vector.broadcast %cst_28 : f32 to vector<8x128xf32>
    %130 = arith.mulf %129, %123 : vector<8x128xf32>
    %131 = arith.subf %128, %130 : vector<8x128xf32>
    %c0_29 = arith.constant 0 : index
    %c0_30 = arith.constant 0 : index
    %c0_31 = arith.constant 0 : index
    %132 = vector.load %arg6[%c0_29, %c0_30, %c0_31] : memref<1x8x128xf32, #tpu.memory_space<vmem>>, vector<1x8x128xf32>
    %133 = vector.shape_cast %132 : vector<1x8x128xf32> to vector<8x128xf32>
    %134 = vector.shape_cast %131 : vector<8x128xf32> to vector<1x8x128xf32>
    tpu.vector_store %arg6[%c0_29, %c0_30, %c0_31], %134 {strides = array<i32>} : memref<1x8x128xf32, #tpu.memory_space<vmem>>, vector<1x8x128xf32>,
    return
  }
  func.func @transform_0(%arg0: i32, %arg1: i32) -> (i32, i32, i32) {
    %c0_i32 = arith.constant 0 : i32
    %c0_i32_0 = arith.constant 0 : i32
    return %arg0, %arg1, %c0_i32 : i32, i32, i32
  }
  func.func @transform_1(%arg0: i32, %arg1: i32) -> (i32, i32, i32) {
    %c0_i32 = arith.constant 0 : i32
    %c0_i32_0 = arith.constant 0 : i32
    %c0_i32_1 = arith.constant 0 : i32
    return %arg0, %c0_i32, %c0_i32_0 : i32, i32, i32
  }
  func.func @transform_2(%arg0: i32, %arg1: i32) -> (i32, i32, i32) {
    %c0_i32 = arith.constant 0 : i32
    %c0_i32_0 = arith.constant 0 : i32
    return %arg0, %arg1, %c0_i32 : i32, i32, i32
  }
  func.func @transform_3(%arg0: i32, %arg1: i32) -> (i32, i32, i32) {
    %c0_i32 = arith.constant 0 : i32
    %c0_i32_0 = arith.constant 0 : i32
    %c0_i32_1 = arith.constant 0 : i32
    return %arg0, %c0_i32, %c0_i32_0 : i32, i32, i32
  }
  func.func @transform_4(%arg0: i32, %arg1: i32) -> (i32, i32, i32) {
    %c0_i32 = arith.constant 0 : i32
    %c0_i32_0 = arith.constant 0 : i32
    return %arg0, %arg1, %c0_i32 : i32, i32, i32
  }
}

</mosaic_0001>

<bundles_post_ra>
// kernel: tpu_custom_call.1
= control target key start
LH: loop header
LB: loop body
LE: loop exit
PB: predicated region body
PF: predicated region fallthrough
CT: control target
= control target key end

     0   :  { %9 = vsyncpa [#allocation3], 0  ;;  %s1213_s0 = inlined_call_operand.vmem [shape: bf16[2,8,128], index: 0, kind: input, shape index: {}]   ;;  %s1214_s1 = inlined_call_operand.hbm [shape: bf16[2,128,128], index: 1, kind: input, shape index: {}]   ;;  %s1215_s2 = inlined_call_operand.vmem [shape: f32[2,8,4], index: 2, kind: input, shape index: {}]   ;;  %s1216_s3 = inlined_call_operand.vmem [shape: f32[2,4,128], index: 3, kind: input, shape index: {}]   ;;  %s1217_s4 = inlined_call_operand.hbm [shape: f32[2,8,128], index: 4, kind: output, shape index: {}]  }
   0x1   :  { %11 = vsyncpa [#allocation3 + $0x1], 0 }
   0x2   :  { %12 = vsyncpa [#allocation4], 0 }
   0x3   :  { %14 = vsyncpa [#allocation4 + $0x1], 0  ;;  %s999_s15 = smov 0   ;;  %s1001_s16 = smov 0  }
   0x4   :  { %s1003_s17 = smov 0   ;;  %s1005_s18 = smov 0  }
   0x5   :  { %s1007_s19 = smov 0   ;;  %s1009_s20 = smov 0  }
   0x6 LB: > { %s696_s21 = sadd.s32 4294967295, %s960_s20   ;;  %s697_s22 = sadd.s32 4294967294, %s960_s20   ;;  %s960_s20 = sphi %s1009_s20, %s20_s20   ;;  %s956_s19 = sphi %s1007_s19, %s1232_s19   ;;  %s952_s18 = sphi %s1005_s18, %s1231_s18   ;;  %s948_s17 = sphi %s1003_s17, %s1230_s17   ;;  %s944_s16 = sphi %s1001_s16, %s1229_s16   ;;  %s940_s15 = sphi %s999_s15, %s1228_s15  }
   0x7   : > { %s32_s23 = sadd.s32 1, %s956_s19  ;;  %s67_s24 = sadd.s32 1, %s948_s17 }
   0x8   : > { %p34_p0 = scmp.ge.s32.totalorder %s32_s23, 2  ;;  %p74_p1 = scmp.ne.s32.totalorder %s948_s17, %s944_s16 }
   0x9   : > { %p75_p2 = scmp.eq.s32.totalorder %s960_s20, 0  ;;  %p80_p3 = scmp.ne.s32.totalorder %s944_s16, %s940_s15 }
   0xa   : > { %s1234_s23 = smov (%p34_p0, %s32_s23), 0  ;;  %p81_p5 = scmp.eq.s32.totalorder %s696_s21, 0 }
   0xb   : > { %p1040_p4 = por %p75_p2, %p74_p1  ;;  %s64_s26 = ssub.s32 %s956_s19, %s1234_s23 }
   0xc   : > { %p160_p6 = scmp.eq.s32.totalorder %s696_s21, 1  ;;  %p65_p7 = scmp.eq.s32.totalorder %s64_s26, 0 }
   0xd   : > { %p1046_p8 = por %p81_p5, %p80_p3  ;;  %p166_p10 = scmp.eq.s32.totalorder %s697_s22, 1 }
   0xe   : > { %p1050_p9 = por %p160_p6, %p74_p1  ;;  %p763_p13 = scmp.lt.s32.totalorder %s960_s20, 2 }
   0xf   : > { %s1055_s29 = scalar_select %p65_p7, %s948_s17, %s67_s24  }
  0x10   : > { %s1221_s28 = scalar_select %p1050_p9, 1, 0 }
  0x11   : > { %p1057_p11 = por %p166_p10, %p80_p3  ;;  %s196_s5 = sand.u32 1, %s948_s17  }
  0x12   : > { %s700_s6 = sshll.u32 %s196_s5, 6  ;;  %s721_s7 = sshll.u32 %s956_s19, 10 }
  0x13   : > { %s1222_s30 = scalar_select %p1057_p11, 1, 0 }
  0x14   : > { %s1068_s10 = scalar_lea.hbm %s1214_s1, %s721_s7  ;;  %s200_s11 = scalar_lea.vmem [#allocation2], %s700_s6 }
  0x15   : > { %s207_s12 = sshll.u32 %s200_s11, 4  ;;  %p1074_p0 = pnand %p763_p13, %p1040_p4  ;;  %s1070_s12 = int_to_ptr.vmem [resolvable:$true] %s207_s12 }
  0x16   : > { %s1079_s14 = scalar_lea.sflag [#allocation3], %s196_s5  ;;  %s848_s21 = scalar_lea.hbm %s1068_s10, 1024 }
  0x17   : > { %p849_p2 = scmp.ne.s32.totalorder %s1068_s10, %s848_s21  ;;  %p850_p3 = pneg %p1074_p0 }
  0x18   : > { %s853_s25 = scalar_lea.hbm %s1214_s1, 2048  ;;  %p854_p4 = scmp.lt.u32.totalorder %s1068_s10, %s1214_s1 }
  0x19   : > { %p851_p5 = pnand %p850_p3, %p849_p2  ;;  %p855_p7 = scmp.lt.u32.totalorder %s853_s25, %s848_s21 }
  0x1a   : > { %p857_p13 = scmp.lt.u32.totalorder %s848_s21, %s1068_s10 }
  0x1b   : > { %p852_p6 = pneg %p851_p5  ;;  %p856_p10 = por %p855_p7, %p854_p4 }
  0x1d   : > { %p858_p12 = por %p857_p13, %p856_p10 }
  0x1f   : > { %p859_p1 = pnand %p858_p12, %p852_p6 }
  0x21   : > { %862 = shalt.err (!%p859_p1)
}
  0x22   : > { %s863_s5 = scalar_lea.vmem %s1070_s12, 1024  ;;  %s962_s7 = smov [#allocation2]  }
  0x23   : > { %p864_p2 = scmp.ne.s32.totalorder %s1070_s12, %s863_s5  ;;  %s868_s8 = sshll.u32 %s962_s7, 4  ;;  %s869_s8 = int_to_ptr.vmem [resolvable:$false] %s868_s8 }
  0x24   : > { %s870_s9 = scalar_lea.vmem %s869_s8, 2048  ;;  %p871_p9 = scmp.lt.s32.totalorder %s1070_s12, %s869_s8 }
  0x25   : > { %p866_p5 = pnand %p864_p2, %p850_p3  ;;  %p872_p4 = scmp.lt.s32.totalorder %s870_s9, %s863_s5 }
  0x27   : > { %p867_p11 = pneg %p866_p5  ;;  %p873_p7 = por %p872_p4, %p871_p9 }
  0x29   : > { %p874_p10 = pnand %p873_p7, %p867_p11 }
  0x2b   : > { %877 = shalt.err (!%p874_p10)
}
  0x2c   : > { %s963_s11 = smov 64   ;;  %s964_s21 = smov 4  }
  0x2d   : > { %758 = dma.hbm_to_vmem [thread:$0]  (!%p1074_p0), %s1068_s10, 1024, %s1070_s12, %s1079_s14, %s963_s11, %s963_s11, %s964_s21  }
  0x2e   : > { %p232_p12 = scmp.lt.s32.totalorder %s960_s20, 3  ;;  %p1224_p1 = scmp.ge.s32.totalorder %s960_s20, 1 }
  0x30   : > { %p233_p3 = pnand %p1224_p1, %p232_p12 }
  0x31   : > { %s1111_s22 = sand.u32 (!%p233_p3), 1, %s944_s16  }
  0x32   : > { %236 = sbr.rel (%p233_p3) target bundleno = 458 (0x1ca), region = 36  ;;  %s704_s24 = sshll.u32 (!%p233_p3), %s1111_s22, 6 }
  0x33   : > { %s239_s25 = scalar_lea.sflag (!%p233_p3), [#allocation3], %s1111_s22  ;;  %s1115_s26 = scalar_lea.vmem (!%p233_p3), [#allocation2], %s704_s24 }
  0x39   : > { %931 = dma.done.wait (%p1046_p8), %s239_s25, 1024  }
  0x3a   : > { %933 = vsyncadd (%p1046_p8), %s239_s25, 4294966272  ;;  %p285_p9 = scmp.lt.s32.totalorder %s952_s18, 1  ;;  %v965_v0 = vmov 0.0   ;;  %s966_s9 = smov 127   ;;  %v832_v4 = vld [vmem:[%s1115_s26] sm:$0xff]   ;;  %v833_v5 = vld [vmem:[%s1115_s26 + $0x8] sm:$0xff]   ;;  %v449_v30 = vlaneseq }
  0x3b   : > { %731 = vmatprep.subr.bf16.mxu0 %v965_v0  ;;  %v834_v6 = vld [vmem:[%s1115_s26 + $0x10] sm:$0xff]   ;;  %v835_v7 = vld [vmem:[%s1115_s26 + $0x18] sm:$0xff]   ;;  %v836_v8 = vld [vmem:[%s1115_s26 + $0x20] sm:$0xff]   ;;  %v967_v11 = vmov 0   ;;  %s968_s11 = smov 126   ;;  %vm969_vm0 = vmmov 0  }
  0x3c   : > { %s1123_s10 = scalar_select %p285_p9, %s952_s18, 1  ;;  %732 = vmatpush3.bf16.msra.mxu0 %v832_v4  ;;  %v837_v10 = vld [vmem:[%s1115_s26 + $0x28] sm:$0xff]   ;;  %826 = vset.pattern.permute.xlu1 %v967_v11  ;;  %v838_v12 = vld [vmem:[%s1115_s26 + $0x30] sm:$0xff]   ;;  %v839_v13 = vld [vmem:[%s1115_s26 + $0x38] sm:$0xff]   ;;  %v970_v14 = vmov 2   ;;  %v971_v17 = vmov 1  }
  0x3d   : > { %733 = vmatprep.subr.bf16.mxu0 %v965_v0  ;;  %823 = vset.pattern.permute.xlu0 %v967_v11  ;;  %v972_v26 = vmov 3   ;;  %v450_v33 = vshrl.u32 %v449_v30, 7  ;;  %s705_s26 = sshll.u32 %s1111_s22, 3  ;;  %s561_s5 = scalar_lea.sflag [#allocation4], %s1111_s22 }
  0x3e   : > { %s706_s12 = sshll.u32 %s1123_s10, 2  ;;  %s707_s13 = sshll.u32 %s1123_s10, 3  ;;  %747 = vmatprep.mubr.msk.bf16.mxu0 %vm969_vm0, %v965_v0 }
  0x3f   : > { %s291_s27 = scalar_lea.vmem %s1213_s0, %s706_s12  ;;  %s298_s8 = scalar_lea.vmem %s1215_s2, %s707_s13  ;;  %v451_v36 = vsub.s32 0, %v450_v33  ;;  %v461_v37 = vsub.s32 1, %v450_v33  ;;  %v472_v53 = vsub.s32 2, %v450_v33 }
  0x40   : > { %v304_v1 = vld [vmem:[%s291_s27] sm:$0xf]  ;;  %734 = vmatpush3.bf16.msra.mxu0 %v833_v5  ;;  %s302_s25 = scalar_lea.vmem %s1216_s3, %s706_s12  ;;  %s718_s10 = sshll.u32 %s952_s18, 7 }
  0x41   : > { %v1135_v2 = vld [vmem:[%s298_s8] sm:$0xff]  ;;  %v305_v3 = vunpack.c.l.bf16 %v304_v1  ;;  %735 = vmatprep.subr.bf16.mxu0 %v965_v0  ;;  %s284_s12 = scalar_lea.vmem [#allocation5], %s705_s26  ;;  %s1164_s27 = scalar_lea.hbm %s1217_s4, %s718_s10 }
  0x42   : > { %430 = vrot.lane.b32.xlu1 %v1135_v2, %s966_s9  ;;  %v422_v9 = vmul.f32 0.5, %v1135_v2  ;;  %v434_v28 = vld [vmem:[%s302_s25] sm:$0xf]  ;;  %s575_s13 = sshll.u32 %s284_s12, 4  ;;  %p1225_p11 = scmp.ne.s32.totalorder %s1221_s28, 0  ;;  %s1166_s13 = int_to_ptr.vmem [resolvable:$true] %s575_s13 }
  0x43   : > { %306 = vmax.xlane.f32.xlu0 %v305_v3  ;;  %v435_v29 = vmul.f32 0.5, %v434_v28  ;;  %v442_v44 = vrot.slane %v434_v28, 1  ;;  %v452_v4 = vrot.slane %v434_v28, %v451_v36  ;;  %s878_s7 = scalar_lea.vmem %s1166_s13, 128  ;;  %s973_s18 = smov [#allocation5]  }
  0x44   : > { %736 = vmatpush3.bf16.msra.mxu0 %v834_v6  ;;  %p879_p8 = scmp.ne.s32.totalorder %s1166_s13, %s878_s7  ;;  %s882_s8 = sshll.u32 %s973_s18, 4  ;;  %s883_s8 = int_to_ptr.vmem [resolvable:$false] %s882_s8 }
  0x45   : > { %737 = vmatprep.subr.bf16.mxu0 %v965_v0  ;;  %v437_v32 = vrot.slane %v435_v29, 2  ;;  %v444_v52 = vmul.f32 %v442_v44, %v434_v28  ;;  %s884_s9 = scalar_lea.vmem %s883_s8, 256  ;;  %p885_p13 = scmp.lt.s32.totalorder %s1166_s13, %s883_s8 }
  0x46   : > { %p880_p0 = pnand %p879_p8, %p1225_p11  ;;  %p886_p2 = scmp.lt.s32.totalorder %s884_s9, %s878_s7 }
  0x47   : > { %v439_v35 = vsub.f32 %v434_v28, %v437_v32  ;;  %v440_v38 = vadd.f32 %v437_v32, %v434_v28  ;;  %v539_v56 = vrot.slane %v444_v52, %v472_v53 }
  0x48   : > { %738 = vmatpush3.bf16.msra.mxu0 %v835_v7  ;;  %v462_v7 = vrot.slane %v434_v28, %v461_v37  ;;  %p881_p6 = pneg %p880_p0  ;;  %p887_p5 = por %p886_p2, %p885_p13 }
  0x49   : > { %739 = vmatprep.subr.bf16.mxu0 %v965_v0  ;;  %v514_v39 = vrot.slane %v439_v35, %v451_v36  ;;  %v526_v40 = vrot.slane %v439_v35, %v461_v37  ;;  %v509_v41 = vrot.slane %v440_v38, %v451_v36  ;;  %v521_v42 = vrot.slane %v440_v38, %v461_v37 }
  0x4a   : > { %p888_p4 = pnand %p887_p5, %p881_p6 }
  0x4c   : > { %740 = vmatpush3.bf16.msra.mxu0 %v836_v8 }
  0x4d   : > { %741 = vmatprep.subr.bf16.mxu0 %v965_v0 }
  0x50   : > { %742 = vmatpush3.bf16.msra.mxu0 %v837_v10 }
  0x51   : > { %743 = vmatprep.subr.bf16.mxu0 %v965_v0 }
  0x54   : > { %744 = vmatpush3.bf16.msra.mxu0 %v838_v12  ;;  %v473_v12 = vrot.slane %v434_v28, %v472_v53 }
  0x55   : > { %745 = vmatprep.subr.bf16.mxu0 %v965_v0 }
  0x58   : > { %746 = vmatpush3.bf16.msra.mxu0 %v839_v13  ;;  %v483_v13 = vsub.s32 3, %v450_v33 }
  0x59   : > { %424 = vrot.lane.b32.xlu0 %v422_v9, %s968_s11 }
  0x5d   : > { %446 = vperm.xlu0 %823, %v1135_v2  }
  0x61   : > { %824 = vset.pattern.permute.xlu0 %v970_v14 }
  0xb4   : > { %v431_v15 = vpop.permute.xlu1 %430 }
  0xb5   : > { %v433_v16 = vmul.f32 %v431_v15, %v1135_v2 }
  0xb7   : > { %533 = vperm.xlu0 %824, %v433_v16  }
  0xbb   : > { %825 = vset.pattern.permute.xlu0 %v971_v17 }
  0xbc   : > { %456 = vperm.xlu0 %825, %v1135_v2  }
  0xc0   : > { %830 = vset.pattern.permute.xlu0 %v970_v14 }
  0xc1   : > { %467 = vperm.xlu0 %830, %v1135_v2  }
  0xd0   : > { %v307_v18 = vpop.xlane.xlu0 %306 }
  0xd1   : > { %v308_v19 = vsub.f32 %v305_v3, %v307_v18  ;;  %v484_v18 = vrot.slane %v434_v28, %v483_v13 }
  0xd3   : > { %v309_v20 = vmul.f32 1.442695, %v308_v19 }
  0xd4   : > { %v425_v21 = vpop.permute.xlu0 %424 }
  0xd5   : > { %840 = vpow2.f32 %v309_v20  ;;  %v427_v22 = vsub.f32 %v1135_v2, %v425_v21  ;;  %v428_v23 = vadd.f32 %v425_v21, %v1135_v2 }
  0xd7   : > { %490 = vperm.xlu1 %826, %v427_v22  }
  0xdb   : > { %827 = vset.pattern.permute.xlu1 %v971_v17 }
  0xdc   : > { %494 = vperm.xlu1 %827, %v427_v22   ;;  %v447_v49 = vpop.permute.xlu0 %446 }
  0xdd   : > { %v453_v10 = vsub.f32 %v447_v49, %v452_v4 }
  0xdf   : > { %v841_v24 = vpop.eup %840  ;;  %v454_v15 = vand.u32 2147483647, %v453_v10 }
  0xe0   : > { %828 = vset.pattern.permute.xlu1 %v967_v11  ;;  %v315_v25 = vpack.c.bf16 %v841_v24, %v841_v24 }
  0xe1   : > { %499 = vperm.xlu1 %828, %v428_v23  }
  0xe2   : > { %748 = vmatmul.mubr.bf16.vlgmr.msra.gmra.mrb[0].mxu0 %v315_v25 }
  0xe5   : > { %829 = vset.pattern.permute.xlu1 %v971_v17 }
  0xe6   : > { %503 = vperm.xlu1 %829, %v428_v23  }
  0xea   : > { %831 = vset.pattern.permute.xlu1 %v972_v26 }
 0x10a   : > { %311 = vadd.xlane.f32.xlu1 %v841_v24 }
 0x11b   : > { %478 = vperm.xlu1 %831, %v1135_v2  }
 0x136   : > { %v534_v57 = vpop.permute.xlu0 %533 }
 0x137   : > { %v540_v63 = vadd.f32 %v539_v56, %v534_v57 }
 0x13b   : > { %v457_v5 = vpop.permute.xlu0 %456 }
 0x13c   : > { %v463_v11 = vsub.f32 %v457_v5, %v462_v7 }
 0x13e   : > { %v464_v16 = vand.u32 2147483647, %v463_v11 }
 0x140   : > { %v468_v14 = vpop.permute.xlu0 %467  ;;  %v465_v20 = vadd.f32 %v464_v16, %v454_v15 }
 0x141   : > { %v474_v17 = vsub.f32 %v468_v14, %v473_v12 }
 0x143   : > { %v475_v21 = vand.u32 2147483647, %v474_v17 }
 0x145   : > { %v476_v25 = vadd.f32 %v475_v21, %v465_v20 }
 0x156   : > { %v491_v27 = vpop.permute.xlu1 %490 }
 0x157   : > { %v515_v45 = vmax.f32 %v491_v27, %v514_v39  ;;  %v546_v58 = vmin.f32 %v491_v27, %v514_v39 }
 0x15b   : > { %v495_v31 = vpop.permute.xlu1 %494 }
 0x15c   : > { %v527_v46 = vmax.f32 %v495_v31, %v526_v40  ;;  %v549_v59 = vmin.f32 %v495_v31, %v526_v40 }
 0x160   : > { %v500_v34 = vpop.permute.xlu1 %499 }
 0x161   : > { %v510_v47 = vmin.f32 %v500_v34, %v509_v41  ;;  %v545_v60 = vmax.f32 %v500_v34, %v509_v41 }
 0x163   : > { %v516_v50 = vsub.f32 %v510_v47, %v515_v45  ;;  %v547_v0 = vsub.f32 %v545_v60, %v546_v58 }
 0x165   : > { %v504_v43 = vpop.permute.xlu1 %503  ;;  %v517_v54 = vmax.f32 %v516_v50, 0.0 }
 0x166   : > { %v522_v48 = vmin.f32 %v504_v43, %v521_v42  ;;  %v548_v61 = vmax.f32 %v504_v43, %v521_v42 }
 0x168   : > { %v528_v51 = vsub.f32 %v522_v48, %v527_v46  ;;  %v550_v1 = vsub.f32 %v548_v61, %v549_v59 }
 0x16a   : > { %v529_v55 = vmax.f32 %v528_v51, 0.0  ;;  %v551_v3 = vmul.f32 %v550_v1, %v547_v0 }
 0x16c   : > { %v530_v62 = vmul.f32 %v529_v55, %v517_v54  ;;  %v553_v9 = vadd.f32 1e-20, %v551_v3 }
 0x16e   : > { %v541_v2 = vsub.f32 %v540_v63, %v530_v62 }
 0x170   : > { %v542_v6 = vadd.f32 1e-20, %v541_v2  ;;  %v552_v30 = vsub.f32 %v551_v3, %v541_v2 }
 0x172   : > { %842 = vrcp.f32 %v542_v6 }
 0x17c   : > { %v843_v23 = vpop.eup %842 }
 0x17d   : > { %v544_v29 = vmul.f32 %v843_v23, %v530_v62 }
 0x197   : > { %v312_v8 = vpop.xlane.xlu1 %311 }
 0x198   : > { %844 = vrcp.f32 %v312_v8 }
 0x199   : > { %846 = vrcp.f32 %v553_v9 }
 0x19b   : > { %v479_v19 = vpop.permute.xlu1 %478 }
 0x19c   : > { %v485_v22 = vsub.f32 %v479_v19, %v484_v18 }
 0x19e   : > { %v486_v26 = vand.u32 2147483647, %v485_v22 }
 0x1a0   : > { %v487_v34 = vadd.f32 %v486_v26, %v476_v25 }
 0x1a2   : > { %v845_v24 = vpop.eup %844 }
 0x1a3   : > { %v847_v27 = vpop.eup %846  ;;  %v314_v31 = vsub.f32 0.0, %v845_v24 }
 0x1a4   : > { %v555_v33 = vmul.f32 %v847_v27, %v552_v30 }
 0x1a6   : > { %v556_v37 = vsub.f32 %v544_v29, %v555_v33 }
 0x1b5   : > { %v414_v32 = vpop.f32.mrb[0].mxu0 }
 0x1b6   : > { %v420_v35 = vmul.f32 %v414_v32, %v314_v31  ;;  %v749_v28 = vpop.f32.mrb[1].mxu0 }
 0x1b7   : > { %v417_v36 = vpop.f32.mrb[2].mxu0 }
 0x1b8   : > { %v557_v38 = vadd.f32 %v487_v34, %v420_v35  ;;  %v750_v39 = vpop.f32.mrb[3].mxu0 }
 0x1ba   : > { %v558_v40 = vsub.f32 %v557_v38, %v556_v37 }
 0x1bc   : > { %559 = vst [vmem:[%s284_s12] sm:$0xff] %v558_v40 }
 0x1bd   : > { %891 = shalt.err (!%p888_p4)
}
 0x1be   : > { %s892_s22 = scalar_lea.hbm %s1164_s27, 128  ;;  %s896_s24 = scalar_lea.hbm %s1217_s4, 256 }
 0x1bf   : > { %p893_p7 = scmp.ne.s32.totalorder %s1164_s27, %s892_s22  ;;  %p897_p1 = scmp.lt.u32.totalorder %s1164_s27, %s1217_s4 }
 0x1c0   : > { %p898_p3 = scmp.lt.u32.totalorder %s896_s24, %s892_s22  ;;  %p900_p8 = scmp.lt.u32.totalorder %s892_s22, %s1164_s27 }
 0x1c1   : > { %p894_p10 = pnand %p893_p7, %p1225_p11 }
 0x1c2   : > { %p899_p9 = por %p898_p3, %p897_p1 }
 0x1c3   : > { %p895_p12 = pneg %p894_p10 }
 0x1c4   : > { %p901_p0 = por %p900_p8, %p899_p9 }
 0x1c6   : > { %p902_p6 = pnand %p901_p0, %p895_p12 }
 0x1c8   : > { %905 = shalt.err (!%p902_p6)
}
 0x1c9   : > { %753 = dma.vmem_to_hbm [thread:$0]  (%p1225_p11), %s1166_s13, 128, %s1164_s27, %s561_s5  }
 0x1ca PF: > { %s587_s10 = sand.u32 1, %s940_s15   ;;  %p1226_p13 = scmp.ne.s32.totalorder %s1222_s30, 0 }
 0x1cb   : > { %p1227_p2 = scmp.ge.s32.totalorder %s960_s20, 2  ;;  %s588_s12 = scalar_lea.sflag [#allocation4], %s587_s10 }
 0x1cd   : > { %p760_p5 = pnand %p1227_p2, %p1226_p13 }
 0x1cf   : > { %935 = dma.done.wait (!%p760_p5), %s588_s12, 128  }
 0x1d0   : > { %937 = vsyncadd (!%p760_p5), %s588_s12, 4294967168  ;;  %s20_s20 = sadd.s32 1, %s960_s20   ;;  %s1228_s15 = smov %s944_s16 }
 0x1d1   : > { %p17_p4 = scmp.ge.s32.totalorder %s20_s20, 4   ;;  %s1229_s16 = smov %s948_s17 }
 0x1d2   : > { %s1230_s17 = smov %s1055_s29  ;;  %s1231_s18 = smov %s956_s19 }
 0x1d3   : > { %s1232_s19 = smov %s1234_s23  ;;  %19 = sbr.rel (!%p17_p4) target bundleno = 6 (0x6), region = 90 }
 0x1da   :  { %593 = vsyncpa [#allocation3], 1 }
 0x1db   :  { %595 = vsyncpa [#allocation3 + $0x1], 1 }
 0x1dc   :  { %596 = vsyncpa [#allocation4], 1 }
 0x1dd   :  { %598 = vsyncpa [#allocation4 + $0x1], 1 }

</bundles_post_ra>
